<compile_context>
chip_gen: v5e
topology: v5e:2x2
jax: 0.10.0
libtpu: 0.0.40
codegen_flags: <defaults>
</compile_context>

<pallas_src>
import functools

import jax
import jax.numpy as jnp
import numpy as np
from jax.experimental import pallas as pl
from jax.experimental.pallas import tpu as pltpu


def _instance_norm_leaky(y, hw, eps=1e-5, slope=0.2):
    # One-pass per-channel (instance) norm over the flattened spatial axis,
    # biased variance (PyTorch InstanceNorm2d), fused with LeakyReLU(0.2).
    inv_hw = 1.0 / hw
    s = jnp.sum(y, axis=1, keepdims=True)
    ss = jnp.sum(y * y, axis=1, keepdims=True)
    mean = s * inv_hw
    var = jnp.maximum(ss * inv_hw - mean * mean, 0.0)   # clamp cancellation
    yn = (y - mean) * jax.lax.rsqrt(var + eps)
    return jnp.where(yn > 0, yn, slope * yn)


def encoder_residual_kernel(x_ref, w1_ref, w2_ref, mask_ref, out_ref, col_ref,
                            *, C, H, W, K, pad, dilation):
    HW = H * W
    x = x_ref[0].astype(jnp.float32)            # (C, HW), lane-dense

    def stage_im2col(a):
        # col[t*C:(t+1)*C, :] = tap-t shifted window of `a`, zeroed at image edges.
        for kh in range(K):
            for kw in range(K):
                t = kh * K + kw
                dh = kh * dilation - pad
                dw = kw * dilation - pad
                off = dh * W + dw               # flat shift for this tap
                if off == 0:
                    shifted = a
                else:
                    # result[p] = a[(p + off) mod HW]; circular wraps and
                    # row-edge crossings are zeroed by the mask below.
                    shifted = pltpu.roll(a, (HW - off) % HW, axis=1)
                col_ref[pl.ds(t * C, C), :] = shifted * mask_ref[pl.ds(t, 1), :]

    def conv_in_leaky(a, w_ref):
        stage_im2col(a)
        # single (Cout, Cin*K*K) @ (Cin*K*K, HW) matmul on the MXU
        y = jnp.dot(w_ref[...], col_ref[...],
                    preferred_element_type=jnp.float32)
        return _instance_norm_leaky(y, HW)

    y1 = conv_in_leaky(x, w1_ref)               # convIn  + IN + LeakyReLU
    y2 = conv_in_leaky(y1, w2_ref)              # convOut + IN + LeakyReLU
    out_ref[0] = (y2 + x).astype(out_ref.dtype)  # residual add


def encoder_residual_block(x, w1, w2, *, dilation=1):
    """x: (N, C, H, W); w1, w2: (Cout, Cin, K, K) PyTorch-layout conv weights."""
    N, C, H, W = x.shape
    K = w1.shape[-1]
    pad = dilation * (K - 1) // 2
    HW = H * W

    # Lane-dense layout: flatten spatial dims (free reshape in XLA).
    x_flat = x.reshape(N, C, HW)

    # Pack weights as (Cout, K*K*Cin); column index = (kh*K + kw)*Cin + ci,
    # matching the im2col row order built in the kernel.
    w1p = jnp.transpose(w1, (0, 2, 3, 1)).reshape(C, K * K * C)
    w2p = jnp.transpose(w2, (0, 2, 3, 1)).reshape(C, K * K * C)

    # Per-tap validity masks over the flattened spatial axis ("same" padding).
    hh = np.arange(H)[:, None]
    ww = np.arange(W)[None, :]
    masks = np.zeros((K * K, HW), np.float32)
    for kh in range(K):
        for kw in range(K):
            dh = kh * dilation - pad
            dw = kw * dilation - pad
            valid = ((hh + dh >= 0) & (hh + dh < H) &
                     (ww + dw >= 0) & (ww + dw < W))
            masks[kh * K + kw] = valid.astype(np.float32).reshape(-1)
    masks = jnp.asarray(masks)

    kernel = functools.partial(encoder_residual_kernel, C=C, H=H, W=W, K=K,
                               pad=pad, dilation=dilation)

    out_flat = pl.pallas_call(
        kernel,
        out_shape=jax.ShapeDtypeStruct((N, C, HW), x.dtype),
        grid_spec=pltpu.PrefetchScalarGridSpec(
            num_scalar_prefetch=0,
            grid=(N,),                           # one batch element per step
            in_specs=[
                pl.BlockSpec((1, C, HW), lambda b: (b, 0, 0)),
                pl.BlockSpec((C, K * K * C), lambda b: (0, 0)),
                pl.BlockSpec((C, K * K * C), lambda b: (0, 0)),
                pl.BlockSpec((K * K, HW), lambda b: (0, 0)),
            ],
            out_specs=pl.BlockSpec((1, C, HW), lambda b: (b, 0, 0)),
            scratch_shapes=[pltpu.VMEM((K * K * C, HW), jnp.float32)],
        ),
        compiler_params=pltpu.CompilerParams(
            dimension_semantics=("parallel",)),
    )(x_flat, w1p, w2p, masks)
    # TODO(synk): for N == 1 (or very large C*H*W on v7x's 64 MiB VMEM) add a
    # "parallel" spatial row-tile grid axis with halo and set vmem_limit_bytes;
    # unnecessary at these shapes.
    return out_flat.reshape(N, C, H, W)


def _reference_forward(x, w1, w2, dilation=1):
    """Pure-JAX reference matching the PyTorch module semantics."""
    def conv_in_leaky(inp, w):
        pad = dilation * (w.shape[-1] - 1) // 2
        y = jax.lax.conv_general_dilated(
            inp, w, window_strides=(1, 1),
            padding=[(pad, pad), (pad, pad)],
            rhs_dilation=(dilation, dilation),
            dimension_numbers=('NCHW', 'OIHW', 'NCHW'))
        mean = y.mean(axis=(2, 3), keepdims=True)
        var = ((y - mean) ** 2).mean(axis=(2, 3), keepdims=True)
        y = (y - mean) / jnp.sqrt(var + 1e-5)
        return jnp.where(y > 0, y, 0.2 * y)

    y = conv_in_leaky(x, w1)
    y = conv_in_leaky(y, w2)
    return y + x


if __name__ == "__main__":
    # Small deterministic config consistent with the module:
    # channels=4, kernelSize=3, stride=1, dilation=1, bias=False, norm='in', act='leaky'
    N, C, H, W, K = 2, 4, 16, 16, 3

    key = jax.random.PRNGKey(0)
    kx, k1, k2 = jax.random.split(key, 3)
    x = jax.random.normal(kx, (N, C, H, W), dtype=jnp.float32)
    w1 = 0.1 * jax.random.normal(k1, (C, C, K, K), dtype=jnp.float32)
    w2 = 0.1 * jax.random.normal(k2, (C, C, K, K), dtype=jnp.float32)

    out = encoder_residual_block(x, w1, w2)
    out = jax.block_until_ready(out)

    ref = jax.block_until_ready(_reference_forward(x, w1, w2))
    np.testing.assert_allclose(np.asarray(out), np.asarray(ref),
                               rtol=2e-3, atol=2e-3)

    print("KERNEL_OK")
</pallas_src>

<mosaic_0001>
module attributes {stable_mosaic.version = 11 : i64} {
  func.func @encoder_residual_kernel(%arg0: i32, %arg1: memref<1x4x256xf32, #tpu.memory_space<vmem>>, %arg2: memref<4x36xf32, #tpu.memory_space<vmem>>, %arg3: memref<4x36xf32, #tpu.memory_space<vmem>>, %arg4: memref<9x256xf32, #tpu.memory_space<vmem>>, %arg5: memref<1x4x256xf32, #tpu.memory_space<vmem>>, %arg6: memref<36x256xf32, #tpu.memory_space<vmem>>) attributes {dimension_semantics = [#tpu.dimension_semantics<parallel>], iteration_bounds = array<i64: 2>, scalar_prefetch = 0 : i64, scratch_operands = 1 : i64, tpu.core_type = #tpu.core_type<tc>, window_params = [{transform_indices = @transform_0, window_bounds = array<i64: 1, 4, 256>}, {pipeline_mode = #tpu.pipeline_mode<synchronous>, transform_indices = @transform_1, window_bounds = array<i64: 4, 36>}, {pipeline_mode = #tpu.pipeline_mode<synchronous>, transform_indices = @transform_2, window_bounds = array<i64: 4, 36>}, {pipeline_mode = #tpu.pipeline_mode<synchronous>, transform_indices = @transform_3, window_bounds = array<i64: 9, 256>}, {transform_indices = @transform_4, window_bounds = array<i64: 1, 4, 256>}]} {
    %c0 = arith.constant 0 : index
    %c0_0 = arith.constant 0 : index
    %c0_1 = arith.constant 0 : index
    %0 = vector.load %arg1[%c0, %c0_0, %c0_1] : memref<1x4x256xf32, #tpu.memory_space<vmem>>, vector<1x4x256xf32>
    %1 = vector.shape_cast %0 : vector<1x4x256xf32> to vector<4x256xf32>
    %c17_i32 = arith.constant 17 : i32
    %2 = tpu.dynamic_rotate %1 by %c17_i32 dim 1 : vector<4x256xf32>, i32 -> vector<4x256xf32>
    %c0_2 = arith.constant 0 : index
    %c0_3 = arith.constant 0 : index
    %3 = vector.load %arg4[%c0_2, %c0_3] : memref<9x256xf32, #tpu.memory_space<vmem>>, vector<1x256xf32>
    %4 = vector.broadcast %3 : vector<1x256xf32> to vector<4x256xf32>
    %5 = arith.mulf %2, %4 : vector<4x256xf32>
    %c0_4 = arith.constant 0 : index
    %c0_5 = arith.constant 0 : index
    %6 = vector.load %arg6[%c0_4, %c0_5] : memref<36x256xf32, #tpu.memory_space<vmem>>, vector<4x256xf32>
    tpu.vector_store %arg6[%c0_4, %c0_5], %5 {strides = array<i32>} : memref<36x256xf32, #tpu.memory_space<vmem>>, vector<4x256xf32>,
    %c16_i32 = arith.constant 16 : i32
    %7 = tpu.dynamic_rotate %1 by %c16_i32 dim 1 : vector<4x256xf32>, i32 -> vector<4x256xf32>
    %c1 = arith.constant 1 : index
    %c0_6 = arith.constant 0 : index
    %8 = vector.load %arg4[%c1, %c0_6] : memref<9x256xf32, #tpu.memory_space<vmem>>, vector<1x256xf32>
    %9 = vector.broadcast %8 : vector<1x256xf32> to vector<4x256xf32>
    %10 = arith.mulf %7, %9 : vector<4x256xf32>
    %c4 = arith.constant 4 : index
    %c0_7 = arith.constant 0 : index
    %11 = vector.load %arg6[%c4, %c0_7] : memref<36x256xf32, #tpu.memory_space<vmem>>, vector<4x256xf32>
    tpu.vector_store %arg6[%c4, %c0_7], %10 {strides = array<i32>} : memref<36x256xf32, #tpu.memory_space<vmem>>, vector<4x256xf32>,
    %c15_i32 = arith.constant 15 : i32
    %12 = tpu.dynamic_rotate %1 by %c15_i32 dim 1 : vector<4x256xf32>, i32 -> vector<4x256xf32>
    %c2 = arith.constant 2 : index
    %c0_8 = arith.constant 0 : index
    %13 = vector.load %arg4[%c2, %c0_8] : memref<9x256xf32, #tpu.memory_space<vmem>>, vector<1x256xf32>
    %14 = vector.broadcast %13 : vector<1x256xf32> to vector<4x256xf32>
    %15 = arith.mulf %12, %14 : vector<4x256xf32>
    %c8 = arith.constant 8 : index
    %c0_9 = arith.constant 0 : index
    %16 = vector.load %arg6[%c8, %c0_9] : memref<36x256xf32, #tpu.memory_space<vmem>>, vector<4x256xf32>
    tpu.vector_store %arg6[%c8, %c0_9], %15 {strides = array<i32>} : memref<36x256xf32, #tpu.memory_space<vmem>>, vector<4x256xf32>,
    %c1_i32 = arith.constant 1 : i32
    %17 = tpu.dynamic_rotate %1 by %c1_i32 dim 1 : vector<4x256xf32>, i32 -> vector<4x256xf32>
    %c3 = arith.constant 3 : index
    %c0_10 = arith.constant 0 : index
    %18 = vector.load %arg4[%c3, %c0_10] : memref<9x256xf32, #tpu.memory_space<vmem>>, vector<1x256xf32>
    %19 = vector.broadcast %18 : vector<1x256xf32> to vector<4x256xf32>
    %20 = arith.mulf %17, %19 : vector<4x256xf32>
    %c12 = arith.constant 12 : index
    %c0_11 = arith.constant 0 : index
    %21 = vector.load %arg6[%c12, %c0_11] : memref<36x256xf32, #tpu.memory_space<vmem>>, vector<4x256xf32>
    tpu.vector_store %arg6[%c12, %c0_11], %20 {strides = array<i32>} : memref<36x256xf32, #tpu.memory_space<vmem>>, vector<4x256xf32>,
    %c4_12 = arith.constant 4 : index
    %c0_13 = arith.constant 0 : index
    %22 = vector.load %arg4[%c4_12, %c0_13] : memref<9x256xf32, #tpu.memory_space<vmem>>, vector<1x256xf32>
    %23 = vector.broadcast %22 : vector<1x256xf32> to vector<4x256xf32>
    %24 = arith.mulf %1, %23 : vector<4x256xf32>
    %c16 = arith.constant 16 : index
    %c0_14 = arith.constant 0 : index
    %25 = vector.load %arg6[%c16, %c0_14] : memref<36x256xf32, #tpu.memory_space<vmem>>, vector<4x256xf32>
    tpu.vector_store %arg6[%c16, %c0_14], %24 {strides = array<i32>} : memref<36x256xf32, #tpu.memory_space<vmem>>, vector<4x256xf32>,
    %c255_i32 = arith.constant 255 : i32
    %26 = tpu.dynamic_rotate %1 by %c255_i32 dim 1 : vector<4x256xf32>, i32 -> vector<4x256xf32>
    %c5 = arith.constant 5 : index
    %c0_15 = arith.constant 0 : index
    %27 = vector.load %arg4[%c5, %c0_15] : memref<9x256xf32, #tpu.memory_space<vmem>>, vector<1x256xf32>
    %28 = vector.broadcast %27 : vector<1x256xf32> to vector<4x256xf32>
    %29 = arith.mulf %26, %28 : vector<4x256xf32>
    %c20 = arith.constant 20 : index
    %c0_16 = arith.constant 0 : index
    %30 = vector.load %arg6[%c20, %c0_16] : memref<36x256xf32, #tpu.memory_space<vmem>>, vector<4x256xf32>
    tpu.vector_store %arg6[%c20, %c0_16], %29 {strides = array<i32>} : memref<36x256xf32, #tpu.memory_space<vmem>>, vector<4x256xf32>,
    %c241_i32 = arith.constant 241 : i32
    %31 = tpu.dynamic_rotate %1 by %c241_i32 dim 1 : vector<4x256xf32>, i32 -> vector<4x256xf32>
    %c6 = arith.constant 6 : index
    %c0_17 = arith.constant 0 : index
    %32 = vector.load %arg4[%c6, %c0_17] : memref<9x256xf32, #tpu.memory_space<vmem>>, vector<1x256xf32>
    %33 = vector.broadcast %32 : vector<1x256xf32> to vector<4x256xf32>
    %34 = arith.mulf %31, %33 : vector<4x256xf32>
    %c24 = arith.constant 24 : index
    %c0_18 = arith.constant 0 : index
    %35 = vector.load %arg6[%c24, %c0_18] : memref<36x256xf32, #tpu.memory_space<vmem>>, vector<4x256xf32>
    tpu.vector_store %arg6[%c24, %c0_18], %34 {strides = array<i32>} : memref<36x256xf32, #tpu.memory_space<vmem>>, vector<4x256xf32>,
    %c240_i32 = arith.constant 240 : i32
    %36 = tpu.dynamic_rotate %1 by %c240_i32 dim 1 : vector<4x256xf32>, i32 -> vector<4x256xf32>
    %c7 = arith.constant 7 : index
    %c0_19 = arith.constant 0 : index
    %37 = vector.load %arg4[%c7, %c0_19] : memref<9x256xf32, #tpu.memory_space<vmem>>, vector<1x256xf32>
    %38 = vector.broadcast %37 : vector<1x256xf32> to vector<4x256xf32>
    %39 = arith.mulf %36, %38 : vector<4x256xf32>
    %c28 = arith.constant 28 : index
    %c0_20 = arith.constant 0 : index
    %40 = vector.load %arg6[%c28, %c0_20] : memref<36x256xf32, #tpu.memory_space<vmem>>, vector<4x256xf32>
    tpu.vector_store %arg6[%c28, %c0_20], %39 {strides = array<i32>} : memref<36x256xf32, #tpu.memory_space<vmem>>, vector<4x256xf32>,
    %c239_i32 = arith.constant 239 : i32
    %41 = tpu.dynamic_rotate %1 by %c239_i32 dim 1 : vector<4x256xf32>, i32 -> vector<4x256xf32>
    %c8_21 = arith.constant 8 : index
    %c0_22 = arith.constant 0 : index
    %42 = vector.load %arg4[%c8_21, %c0_22] : memref<9x256xf32, #tpu.memory_space<vmem>>, vector<1x256xf32>
    %43 = vector.broadcast %42 : vector<1x256xf32> to vector<4x256xf32>
    %44 = arith.mulf %41, %43 : vector<4x256xf32>
    %c32 = arith.constant 32 : index
    %c0_23 = arith.constant 0 : index
    %45 = vector.load %arg6[%c32, %c0_23] : memref<36x256xf32, #tpu.memory_space<vmem>>, vector<4x256xf32>
    tpu.vector_store %arg6[%c32, %c0_23], %44 {strides = array<i32>} : memref<36x256xf32, #tpu.memory_space<vmem>>, vector<4x256xf32>,
    %c0_24 = arith.constant 0 : index
    %c0_25 = arith.constant 0 : index
    %46 = vector.load %arg2[%c0_24, %c0_25] : memref<4x36xf32, #tpu.memory_space<vmem>>, vector<4x36xf32>
    %c0_26 = arith.constant 0 : index
    %c0_27 = arith.constant 0 : index
    %47 = vector.load %arg6[%c0_26, %c0_27] : memref<36x256xf32, #tpu.memory_space<vmem>>, vector<36x256xf32>
    %cst = arith.constant dense<0.000000e+00> : vector<4x256xf32>
    %48 = tpu.matmul %46, %47, %cst {dimension_numbers = #tpu.dot_dimension_numbers<[1], [0], [0], [1], [0, 0, 1, 1], [], []>} : vector<4x36xf32>, vector<36x256xf32>, vector<4x256xf32> -> vector<4x256xf32>
    %cst_28 = arith.constant dense<0.000000e+00> : vector<4xf32>
    %49 = vector.multi_reduction <add>, %48, %cst_28 [1] : vector<4x256xf32> to vector<4xf32>
    %50 = vector.shape_cast %49 : vector<4xf32> to vector<4x1xf32>
    %51 = arith.mulf %48, %48 : vector<4x256xf32>
    %cst_29 = arith.constant dense<0.000000e+00> : vector<4xf32>
    %52 = vector.multi_reduction <add>, %51, %cst_29 [1] : vector<4x256xf32> to vector<4xf32>
    %53 = vector.shape_cast %52 : vector<4xf32> to vector<4x1xf32>
    %cst_30 = arith.constant 3.906250e-03 : f32
    %54 = vector.broadcast %cst_30 : f32 to vector<4x1xf32>
    %55 = arith.mulf %50, %54 : vector<4x1xf32>
    %cst_31 = arith.constant 3.906250e-03 : f32
    %56 = vector.broadcast %cst_31 : f32 to vector<4x1xf32>
    %57 = arith.mulf %53, %56 : vector<4x1xf32>
    %58 = arith.mulf %55, %55 : vector<4x1xf32>
    %59 = arith.subf %57, %58 : vector<4x1xf32>
    %cst_32 = arith.constant 0.000000e+00 : f32
    %60 = vector.broadcast %cst_32 : f32 to vector<4x1xf32>
    %61 = arith.maximumf %59, %60 : vector<4x1xf32>
    %62 = vector.broadcast %55 : vector<4x1xf32> to vector<4x256xf32>
    %63 = arith.subf %48, %62 : vector<4x256xf32>
    %cst_33 = arith.constant 9.99999974E-6 : f32
    %64 = vector.broadcast %cst_33 : f32 to vector<4x1xf32>
    %65 = arith.addf %61, %64 : vector<4x1xf32>
    %66 = math.rsqrt %65 : vector<4x1xf32>
    %67 = vector.broadcast %66 : vector<4x1xf32> to vector<4x256xf32>
    %68 = arith.mulf %63, %67 : vector<4x256xf32>
    %cst_34 = arith.constant 0.000000e+00 : f32
    %69 = vector.broadcast %cst_34 : f32 to vector<4x256xf32>
    %70 = arith.cmpf ogt, %68, %69 : vector<4x256xf32>
    %cst_35 = arith.constant 2.000000e-01 : f32
    %71 = vector.broadcast %cst_35 : f32 to vector<4x256xf32>
    %72 = arith.mulf %71, %68 : vector<4x256xf32>
    %73 = arith.select %70, %68, %72 : vector<4x256xi1>, vector<4x256xf32>
    %c17_i32_36 = arith.constant 17 : i32
    %74 = tpu.dynamic_rotate %73 by %c17_i32_36 dim 1 : vector<4x256xf32>, i32 -> vector<4x256xf32>
    %c0_37 = arith.constant 0 : index
    %c0_38 = arith.constant 0 : index
    %75 = vector.load %arg4[%c0_37, %c0_38] : memref<9x256xf32, #tpu.memory_space<vmem>>, vector<1x256xf32>
    %76 = vector.broadcast %75 : vector<1x256xf32> to vector<4x256xf32>
    %77 = arith.mulf %74, %76 : vector<4x256xf32>
    %c0_39 = arith.constant 0 : index
    %c0_40 = arith.constant 0 : index
    %78 = vector.load %arg6[%c0_39, %c0_40] : memref<36x256xf32, #tpu.memory_space<vmem>>, vector<4x256xf32>
    tpu.vector_store %arg6[%c0_39, %c0_40], %77 {strides = array<i32>} : memref<36x256xf32, #tpu.memory_space<vmem>>, vector<4x256xf32>,
    %c16_i32_41 = arith.constant 16 : i32
    %79 = tpu.dynamic_rotate %73 by %c16_i32_41 dim 1 : vector<4x256xf32>, i32 -> vector<4x256xf32>
    %c1_42 = arith.constant 1 : index
    %c0_43 = arith.constant 0 : index
    %80 = vector.load %arg4[%c1_42, %c0_43] : memref<9x256xf32, #tpu.memory_space<vmem>>, vector<1x256xf32>
    %81 = vector.broadcast %80 : vector<1x256xf32> to vector<4x256xf32>
    %82 = arith.mulf %79, %81 : vector<4x256xf32>
    %c4_44 = arith.constant 4 : index
    %c0_45 = arith.constant 0 : index
    %83 = vector.load %arg6[%c4_44, %c0_45] : memref<36x256xf32, #tpu.memory_space<vmem>>, vector<4x256xf32>
    tpu.vector_store %arg6[%c4_44, %c0_45], %82 {strides = array<i32>} : memref<36x256xf32, #tpu.memory_space<vmem>>, vector<4x256xf32>,
    %c15_i32_46 = arith.constant 15 : i32
    %84 = tpu.dynamic_rotate %73 by %c15_i32_46 dim 1 : vector<4x256xf32>, i32 -> vector<4x256xf32>
    %c2_47 = arith.constant 2 : index
    %c0_48 = arith.constant 0 : index
    %85 = vector.load %arg4[%c2_47, %c0_48] : memref<9x256xf32, #tpu.memory_space<vmem>>, vector<1x256xf32>
    %86 = vector.broadcast %85 : vector<1x256xf32> to vector<4x256xf32>
    %87 = arith.mulf %84, %86 : vector<4x256xf32>
    %c8_49 = arith.constant 8 : index
    %c0_50 = arith.constant 0 : index
    %88 = vector.load %arg6[%c8_49, %c0_50] : memref<36x256xf32, #tpu.memory_space<vmem>>, vector<4x256xf32>
    tpu.vector_store %arg6[%c8_49, %c0_50], %87 {strides = array<i32>} : memref<36x256xf32, #tpu.memory_space<vmem>>, vector<4x256xf32>,
    %c1_i32_51 = arith.constant 1 : i32
    %89 = tpu.dynamic_rotate %73 by %c1_i32_51 dim 1 : vector<4x256xf32>, i32 -> vector<4x256xf32>
    %c3_52 = arith.constant 3 : index
    %c0_53 = arith.constant 0 : index
    %90 = vector.load %arg4[%c3_52, %c0_53] : memref<9x256xf32, #tpu.memory_space<vmem>>, vector<1x256xf32>
    %91 = vector.broadcast %90 : vector<1x256xf32> to vector<4x256xf32>
    %92 = arith.mulf %89, %91 : vector<4x256xf32>
    %c12_54 = arith.constant 12 : index
    %c0_55 = arith.constant 0 : index
    %93 = vector.load %arg6[%c12_54, %c0_55] : memref<36x256xf32, #tpu.memory_space<vmem>>, vector<4x256xf32>
    tpu.vector_store %arg6[%c12_54, %c0_55], %92 {strides = array<i32>} : memref<36x256xf32, #tpu.memory_space<vmem>>, vector<4x256xf32>,
    %c4_56 = arith.constant 4 : index
    %c0_57 = arith.constant 0 : index
    %94 = vector.load %arg4[%c4_56, %c0_57] : memref<9x256xf32, #tpu.memory_space<vmem>>, vector<1x256xf32>
    %95 = vector.broadcast %94 : vector<1x256xf32> to vector<4x256xf32>
    %96 = arith.mulf %73, %95 : vector<4x256xf32>
    %c16_58 = arith.constant 16 : index
    %c0_59 = arith.constant 0 : index
    %97 = vector.load %arg6[%c16_58, %c0_59] : memref<36x256xf32, #tpu.memory_space<vmem>>, vector<4x256xf32>
    tpu.vector_store %arg6[%c16_58, %c0_59], %96 {strides = array<i32>} : memref<36x256xf32, #tpu.memory_space<vmem>>, vector<4x256xf32>,
    %c255_i32_60 = arith.constant 255 : i32
    %98 = tpu.dynamic_rotate %73 by %c255_i32_60 dim 1 : vector<4x256xf32>, i32 -> vector<4x256xf32>
    %c5_61 = arith.constant 5 : index
    %c0_62 = arith.constant 0 : index
    %99 = vector.load %arg4[%c5_61, %c0_62] : memref<9x256xf32, #tpu.memory_space<vmem>>, vector<1x256xf32>
    %100 = vector.broadcast %99 : vector<1x256xf32> to vector<4x256xf32>
    %101 = arith.mulf %98, %100 : vector<4x256xf32>
    %c20_63 = arith.constant 20 : index
    %c0_64 = arith.constant 0 : index
    %102 = vector.load %arg6[%c20_63, %c0_64] : memref<36x256xf32, #tpu.memory_space<vmem>>, vector<4x256xf32>
    tpu.vector_store %arg6[%c20_63, %c0_64], %101 {strides = array<i32>} : memref<36x256xf32, #tpu.memory_space<vmem>>, vector<4x256xf32>,
    %c241_i32_65 = arith.constant 241 : i32
    %103 = tpu.dynamic_rotate %73 by %c241_i32_65 dim 1 : vector<4x256xf32>, i32 -> vector<4x256xf32>
    %c6_66 = arith.constant 6 : index
    %c0_67 = arith.constant 0 : index
    %104 = vector.load %arg4[%c6_66, %c0_67] : memref<9x256xf32, #tpu.memory_space<vmem>>, vector<1x256xf32>
    %105 = vector.broadcast %104 : vector<1x256xf32> to vector<4x256xf32>
    %106 = arith.mulf %103, %105 : vector<4x256xf32>
    %c24_68 = arith.constant 24 : index
    %c0_69 = arith.constant 0 : index
    %107 = vector.load %arg6[%c24_68, %c0_69] : memref<36x256xf32, #tpu.memory_space<vmem>>, vector<4x256xf32>
    tpu.vector_store %arg6[%c24_68, %c0_69], %106 {strides = array<i32>} : memref<36x256xf32, #tpu.memory_space<vmem>>, vector<4x256xf32>,
    %c240_i32_70 = arith.constant 240 : i32
    %108 = tpu.dynamic_rotate %73 by %c240_i32_70 dim 1 : vector<4x256xf32>, i32 -> vector<4x256xf32>
    %c7_71 = arith.constant 7 : index
    %c0_72 = arith.constant 0 : index
    %109 = vector.load %arg4[%c7_71, %c0_72] : memref<9x256xf32, #tpu.memory_space<vmem>>, vector<1x256xf32>
    %110 = vector.broadcast %109 : vector<1x256xf32> to vector<4x256xf32>
    %111 = arith.mulf %108, %110 : vector<4x256xf32>
    %c28_73 = arith.constant 28 : index
    %c0_74 = arith.constant 0 : index
    %112 = vector.load %arg6[%c28_73, %c0_74] : memref<36x256xf32, #tpu.memory_space<vmem>>, vector<4x256xf32>
    tpu.vector_store %arg6[%c28_73, %c0_74], %111 {strides = array<i32>} : memref<36x256xf32, #tpu.memory_space<vmem>>, vector<4x256xf32>,
    %c239_i32_75 = arith.constant 239 : i32
    %113 = tpu.dynamic_rotate %73 by %c239_i32_75 dim 1 : vector<4x256xf32>, i32 -> vector<4x256xf32>
    %c8_76 = arith.constant 8 : index
    %c0_77 = arith.constant 0 : index
    %114 = vector.load %arg4[%c8_76, %c0_77] : memref<9x256xf32, #tpu.memory_space<vmem>>, vector<1x256xf32>
    %115 = vector.broadcast %114 : vector<1x256xf32> to vector<4x256xf32>
    %116 = arith.mulf %113, %115 : vector<4x256xf32>
    %c32_78 = arith.constant 32 : index
    %c0_79 = arith.constant 0 : index
    %117 = vector.load %arg6[%c32_78, %c0_79] : memref<36x256xf32, #tpu.memory_space<vmem>>, vector<4x256xf32>
    tpu.vector_store %arg6[%c32_78, %c0_79], %116 {strides = array<i32>} : memref<36x256xf32, #tpu.memory_space<vmem>>, vector<4x256xf32>,
    %c0_80 = arith.constant 0 : index
    %c0_81 = arith.constant 0 : index
    %118 = vector.load %arg3[%c0_80, %c0_81] : memref<4x36xf32, #tpu.memory_space<vmem>>, vector<4x36xf32>
    %c0_82 = arith.constant 0 : index
    %c0_83 = arith.constant 0 : index
    %119 = vector.load %arg6[%c0_82, %c0_83] : memref<36x256xf32, #tpu.memory_space<vmem>>, vector<36x256xf32>
    %cst_84 = arith.constant dense<0.000000e+00> : vector<4x256xf32>
    %120 = tpu.matmul %118, %119, %cst_84 {dimension_numbers = #tpu.dot_dimension_numbers<[1], [0], [0], [1], [0, 0, 1, 1], [], []>} : vector<4x36xf32>, vector<36x256xf32>, vector<4x256xf32> -> vector<4x256xf32>
    %cst_85 = arith.constant dense<0.000000e+00> : vector<4xf32>
    %121 = vector.multi_reduction <add>, %120, %cst_85 [1] : vector<4x256xf32> to vector<4xf32>
    %122 = vector.shape_cast %121 : vector<4xf32> to vector<4x1xf32>
    %123 = arith.mulf %120, %120 : vector<4x256xf32>
    %cst_86 = arith.constant dense<0.000000e+00> : vector<4xf32>
    %124 = vector.multi_reduction <add>, %123, %cst_86 [1] : vector<4x256xf32> to vector<4xf32>
    %125 = vector.shape_cast %124 : vector<4xf32> to vector<4x1xf32>
    %cst_87 = arith.constant 3.906250e-03 : f32
    %126 = vector.broadcast %cst_87 : f32 to vector<4x1xf32>
    %127 = arith.mulf %122, %126 : vector<4x1xf32>
    %cst_88 = arith.constant 3.906250e-03 : f32
    %128 = vector.broadcast %cst_88 : f32 to vector<4x1xf32>
    %129 = arith.mulf %125, %128 : vector<4x1xf32>
    %130 = arith.mulf %127, %127 : vector<4x1xf32>
    %131 = arith.subf %129, %130 : vector<4x1xf32>
    %cst_89 = arith.constant 0.000000e+00 : f32
    %132 = vector.broadcast %cst_89 : f32 to vector<4x1xf32>
    %133 = arith.maximumf %131, %132 : vector<4x1xf32>
    %134 = vector.broadcast %127 : vector<4x1xf32> to vector<4x256xf32>
    %135 = arith.subf %120, %134 : vector<4x256xf32>
    %cst_90 = arith.constant 9.99999974E-6 : f32
    %136 = vector.broadcast %cst_90 : f32 to vector<4x1xf32>
    %137 = arith.addf %133, %136 : vector<4x1xf32>
    %138 = math.rsqrt %137 : vector<4x1xf32>
    %139 = vector.broadcast %138 : vector<4x1xf32> to vector<4x256xf32>
    %140 = arith.mulf %135, %139 : vector<4x256xf32>
    %cst_91 = arith.constant 0.000000e+00 : f32
    %141 = vector.broadcast %cst_91 : f32 to vector<4x256xf32>
    %142 = arith.cmpf ogt, %140, %141 : vector<4x256xf32>
    %cst_92 = arith.constant 2.000000e-01 : f32
    %143 = vector.broadcast %cst_92 : f32 to vector<4x256xf32>
    %144 = arith.mulf %143, %140 : vector<4x256xf32>
    %145 = arith.select %142, %140, %144 : vector<4x256xi1>, vector<4x256xf32>
    %146 = arith.addf %145, %1 : vector<4x256xf32>
    %c0_93 = arith.constant 0 : index
    %c0_94 = arith.constant 0 : index
    %c0_95 = arith.constant 0 : index
    %147 = vector.load %arg5[%c0_93, %c0_94, %c0_95] : memref<1x4x256xf32, #tpu.memory_space<vmem>>, vector<1x4x256xf32>
    %148 = vector.shape_cast %147 : vector<1x4x256xf32> to vector<4x256xf32>
    %149 = vector.shape_cast %146 : vector<4x256xf32> to vector<1x4x256xf32>
    tpu.vector_store %arg5[%c0_93, %c0_94, %c0_95], %149 {strides = array<i32>} : memref<1x4x256xf32, #tpu.memory_space<vmem>>, vector<1x4x256xf32>,
    return
  }
  func.func @transform_0(%arg0: i32) -> (i32, i32, i32) {
    %c0_i32 = arith.constant 0 : i32
    %c0_i32_0 = arith.constant 0 : i32
    %c0_i32_1 = arith.constant 0 : i32
    return %arg0, %c0_i32, %c0_i32_0 : i32, i32, i32
  }
  func.func @transform_1(%arg0: i32) -> (i32, i32) {
    %c0_i32 = arith.constant 0 : i32
    %c0_i32_0 = arith.constant 0 : i32
    %c0_i32_1 = arith.constant 0 : i32
    return %c0_i32, %c0_i32_0 : i32, i32
  }
  func.func @transform_2(%arg0: i32) -> (i32, i32) {
    %c0_i32 = arith.constant 0 : i32
    %c0_i32_0 = arith.constant 0 : i32
    %c0_i32_1 = arith.constant 0 : i32
    return %c0_i32, %c0_i32_0 : i32, i32
  }
  func.func @transform_3(%arg0: i32) -> (i32, i32) {
    %c0_i32 = arith.constant 0 : i32
    %c0_i32_0 = arith.constant 0 : i32
    %c0_i32_1 = arith.constant 0 : i32
    return %c0_i32, %c0_i32_0 : i32, i32
  }
  func.func @transform_4(%arg0: i32) -> (i32, i32, i32) {
    %c0_i32 = arith.constant 0 : i32
    %c0_i32_0 = arith.constant 0 : i32
    %c0_i32_1 = arith.constant 0 : i32
    return %arg0, %c0_i32, %c0_i32_0 : i32, i32, i32
  }
}

</mosaic_0001>

<bundles_post_ra>
// kernel: tpu_custom_call.1
= control target key start
LH: loop header
LB: loop body
LE: loop exit
PB: predicated region body
PF: predicated region fallthrough
CT: control target
= control target key end

     0   :  { %9 = vsyncpa [#allocation4], 0  ;;  %s1624_s0 = inlined_call_operand.hbm [shape: f32[2,4,256], index: 0, kind: input, shape index: {}]   ;;  %s1625_s1 = inlined_call_operand.hbm [shape: f32[4,36], index: 1, kind: input, shape index: {}]   ;;  %s1626_s2 = inlined_call_operand.hbm [shape: f32[4,36], index: 2, kind: input, shape index: {}]   ;;  %s1627_s3 = inlined_call_operand.hbm [shape: f32[9,256], index: 3, kind: input, shape index: {}]   ;;  %s1628_s4 = inlined_call_operand.hbm [shape: f32[2,4,256], index: 4, kind: output, shape index: {}]  }
   0x1   :  { %11 = vsyncpa [#allocation4 + $0x1], 0 }
   0x2   :  { %12 = vsyncpa [#allocation7], 0 }
   0x3   :  { %13 = vsyncpa [#allocation10], 0 }
   0x4   :  { %14 = vsyncpa [#allocation5], 0 }
   0x5   :  { %16 = vsyncpa [#allocation5 + $0x1], 0  ;;  %s1334_s15 = smov 0   ;;  %s1336_s16 = smov 0  }
   0x6   :  { %s1338_s17 = smov 0   ;;  %s1340_s18 = smov 0  }
   0x7 LB: > { %s1355_s19 = sadd.s32 4294967295, %s1294_s18   ;;  %s979_s20 = sadd.s32 4294967294, %s1294_s18   ;;  %s1294_s18 = sphi %s1340_s18, %s1639_s18   ;;  %s1290_s17 = sphi %s1338_s17, %s1638_s17   ;;  %s1286_s16 = sphi %s1336_s16, %s1637_s16   ;;  %s1282_s15 = sphi %s1334_s15, %s1636_s15  }
   0x8   : > { %p42_p0 = scmp.ne.s32.totalorder %s1286_s16, %s1282_s15  ;;  %p43_p1 = scmp.eq.s32.totalorder %s1355_s19, 0 }
   0x9   : > { %p129_p2 = scmp.eq.s32.totalorder %s1355_s19, 1  ;;  %p135_p3 = scmp.eq.s32.totalorder %s979_s20, 1 }
   0xa   : > { %p1364_p4 = por %p43_p1, %p42_p0  ;;  %p980_p5 = scmp.ge.s32.totalorder %s1294_s18, 1 }
   0xb   : > { %p1369_p6 = por %p135_p3, %p42_p0  ;;  %p142_p7 = scmp.lt.s32.totalorder %s1294_s18, 3 }
   0xc   : > { %s154_s25 = sshll.u32 %s1625_s1, 4  ;;  %s1296_s27 = smov [#allocation6]   ;;  %s155_s25 = int_to_ptr.hbm [resolvable:$true] %s154_s25 }
   0xd   : > { %p1377_p8 = pnand %p980_p5, %p142_p7  ;;  %s156_s28 = sshll.u32 %s1296_s27, 4  ;;  %s157_s28 = int_to_ptr.vmem [resolvable:$true] %s156_s28 }
   0xe   : > { %s166_s5 = sshll.u32 %s1626_s2, 4  ;;  %s177_s9 = sshll.u32 %s1627_s3, 4  ;;  %s167_s5 = int_to_ptr.hbm [resolvable:$true] %s166_s5  ;;  %s178_s9 = int_to_ptr.hbm [resolvable:$true] %s177_s9 }
   0xf   : > { %p1025_p10 = pneg %p1377_p8  ;;  %s1297_s10 = smov [#allocation8]  }
  0x10   : > { %s168_s11 = sshll.u32 %s1297_s10, 4  ;;  %s1298_s12 = smov [#allocation9]   ;;  %s169_s11 = int_to_ptr.vmem [resolvable:$true] %s168_s11 }
  0x11   : > { %p1389_p11 = pnand %p1025_p10, %p43_p1  ;;  %s179_s13 = sshll.u32 %s1298_s12, 4  ;;  %s180_s13 = int_to_ptr.vmem [resolvable:$true] %s179_s13 }
  0x12   : > { %s1299_s14 = smov 256   ;;  %s1300_s20 = smov 16  }
  0x13   : > { %1028 = dma.hbm_to_vmem [thread:$0]  (!%p1389_p11), %s155_s25, 64, %s157_s28, [#allocation7]  }
  0x14   : > { %1031 = dma.hbm_to_vmem [thread:$0]  (!%p1389_p11), %s167_s5, 64, %s169_s11, [#allocation7]  }
  0x15   : > { %1034 = dma.hbm_to_vmem [thread:$0]  (!%p1389_p11), %s178_s9, 512, %s180_s13, [#allocation10], %s1299_s14, %s1299_s14, %s1300_s20  }
  0x16   : > { %s1403_s23 = sadd.s32 1, %s1294_s18   ;;  %s29_s25 = sadd.s32 1, %s1290_s17 }
  0x17   : > { %s26_s24 = ssub.s32 %s1294_s18, %s1403_s23  ;;  %p36_p13 = scmp.ne.s32.totalorder %s1290_s17, %s1286_s16 }
  0x18   : > { %p27_p12 = scmp.eq.s32.totalorder %s26_s24, 0  ;;  %p37_p0 = scmp.eq.s32.totalorder %s1294_s18, 0 }
  0x19   : > { %p1416_p3 = por %p129_p2, %p36_p13  ;;  %p1046_p5 = scmp.lt.s32.totalorder %s1294_s18, 2 }
  0x1a   : > { %s1412_s27 = scalar_select %p27_p12, %s1290_s17, %s29_s25  }
  0x1b   : > { %s193_s29 = sand.u32 1, %s1290_s17   ;;  %s1007_s30 = sshll.u32 %s1294_s18, 3 }
  0x1c   : > { %p38_p7 = por %p37_p0, %p36_p13  ;;  %s985_s5 = sshll.u32 %s193_s29, 3 }
  0x1d   : > { %s202_s8 = scalar_lea.hbm %s1624_s0, %s1007_s30  ;;  %s197_s10 = scalar_lea.vmem [#allocation3], %s985_s5 }
  0x1e   : > { %s204_s9 = sshll.u32 %s202_s8, 4  ;;  %s206_s11 = sshll.u32 %s197_s10, 4  ;;  %s205_s9 = int_to_ptr.hbm [resolvable:$true] %s204_s9  ;;  %s207_s11 = int_to_ptr.vmem [resolvable:$true] %s206_s11 }
  0x1f   : > { %p1426_p10 = pnand %p1046_p5, %p38_p7  ;;  %s194_s13 = scalar_lea.sflag [#allocation4], %s193_s29 }
  0x20   : > { %s1190_s14 = sshra.s32 %s205_s9, 4  ;;  %s1197_s30 = scalar_lea.hbm %s1624_s0, 16  ;;  %s1191_s14 = int_to_ptr.hbm [resolvable:$true] %s1190_s14 }
  0x21   : > { %s1192_s20 = scalar_lea.hbm %s1191_s14, 8  ;;  %p1194_p11 = pneg %p1426_p10 }
  0x22   : > { %p1193_p2 = scmp.ne.s32.totalorder %s1191_s14, %s1192_s20  ;;  %p1198_p0 = scmp.lt.s32.totalorder %s1191_s14, %s1624_s0 }
  0x23   : > { %p1199_p5 = scmp.lt.s32.totalorder %s1197_s30, %s1192_s20 }
  0x24   : > { %p1195_p12 = pnand %p1194_p11, %p1193_p2 }
  0x25   : > { %p1200_p7 = por %p1199_p5, %p1198_p0 }
  0x26   : > { %p1196_p13 = pneg %p1195_p12 }
  0x28   : > { %p1201_p9 = pnand %p1200_p7, %p1196_p13 }
  0x2a   : > { %1204 = shalt.err (!%p1201_p9)
}
  0x2b   : > { %1038 = dma.hbm_to_vmem [thread:$0]  (!%p1426_p10), %s205_s9, 128, %s207_s11, %s194_s13  }
  0x2c   : > { %215 = sbr.rel (%p1377_p8) target bundleno = 1044 (0x414), region = 36  ;;  %s1443_s29 = sand.u32 (!%p1377_p8), 1, %s1286_s16  }
  0x2d   : > { %s989_s7 = sshll.u32 (!%p1377_p8), %s1443_s29, 3  ;;  %s218_s8 = scalar_lea.sflag (!%p1377_p8), [#allocation4], %s1443_s29 }
  0x2e   : > { %s221_s10 = scalar_lea.vmem (!%p1377_p8), [#allocation3], %s989_s7 }
  0x31   : > { %1265 = dma.done.wait (%p1364_p4), %s218_s8, 128  }
  0x32   : > { %1267 = vsyncadd (%p1364_p4), %s218_s8, 4294967168 }
  0x33   : > { %1269 = dma.done.wait (%p43_p1), [#allocation7], 128  }
  0x34   : > { %1271 = vsyncadd (%p43_p1), [#allocation7], 4294967168 }
  0x35   : > { %1273 = dma.done.wait (%p43_p1), [#allocation10], 512  }
  0x36   : > { %1275 = vsyncadd (%p43_p1), [#allocation10], 4294966784  ;;  %v262_v0 = vld [vmem:[%s221_s10] sm:$0xff]  ;;  %s1301_s21 = smov 16   ;;  %vm375_vm0 = vcmask 1043456   ;;  %s1302_s26 = smov 15   ;;  %v273_v26 = vlaneseq }
  0x37   : > { %264 = vst [vmem:[#allocation1] ss:$2 sm:$0xff] %v262_v0  ;;  %v370_v3 = vld [vmem:[#allocation9 + $0x4] ss:$8 sm:$0x3]  ;;  %s1303_s9 = smov 1  }
  0x38   : > { %v373_v6 = vperm.slane %v370_v3, 1  ;;  %v372_v7 = vperm.slane %v370_v3, 0  ;;  %s1304_s11 = smov 127   ;;  %s1305_s12 = smov 113   ;;  %v1478_v27 = vand.u32 127, %v273_v26  ;;  %vm502_vm9 = vcmask 293888  }
  0x39   : > { %s1306_s13 = smov 112   ;;  %s1307_s14 = smov 17   ;;  %v301_v28 = vld [vmem:[#allocation9 + $0x1] ss:$8 sm:$0x3] }
  0x3a   : > { %v374_v8 = vrot.slane %v373_v6, 4  ;;  %s1308_s20 = smov 111   ;;  %vm297_vm1 = vcmp.lt.s32.totalorder %v1478_v27, 16  ;;  %v303_v29 = vperm.slane %v301_v28, 0  ;;  %v304_v30 = vperm.slane %v301_v28, 1  ;;  %s1008_s24 = sshll.u32 %s1355_s19, 3 }
  0x3b   : > { %v353_v41 = vld [vmem:[#allocation9 + $0x3] ss:$8 sm:$0x3]  ;;  %vm349_vm2 = vcmp.lt.s32.totalorder %v1478_v27, 1  ;;  %vm396_vm3 = vcmp.lt.s32.totalorder %v1478_v27, 127  ;;  %vm425_vm4 = vcmp.lt.s32.totalorder %v1478_v27, 113  ;;  %s875_s5 = scalar_lea.hbm %s1628_s4, %s1008_s24 }
  0x3c   : > { %v376_v11 = vsel %vm375_vm0, %v372_v7, %v374_v8  ;;  %v355_v42 = vperm.slane %v353_v41, 0  ;;  %v356_v43 = vperm.slane %v353_v41, 1  ;;  %v400_v45 = vld [vmem:[#allocation9 + $0x5] ss:$8 sm:$0x3]  ;;  %vm448_vm5 = vcmp.lt.s32.totalorder %v1478_v27, 112 }
  0x3d   : > { %v378_v12 = vmul.f32 %v376_v11, %v262_v0  ;;  %v402_v48 = vperm.slane %v400_v45, 0  ;;  %v403_v49 = vperm.slane %v400_v45, 1  ;;  %v429_v61 = vld [vmem:[#allocation9 + $0x6] ss:$8 sm:$0x3]  ;;  %vm275_vm6 = vcmp.lt.s32.totalorder %v1478_v27, 17 }
  0x3e   : > { %v265_v1 = vld.sshfl [vmem:[#allocation1] sm:$0xff pattern:$0x75316420]  ;;  %v266_v2 = vld.sshfl [vmem:[#allocation1 + $0x8] sm:$0xff pattern:$0x75316420] }
  0x3f   : > { %288 = vst [vmem:[#allocation1] ss:$2 sm:$0xff] %v262_v0  ;;  %v431_v62 = vperm.slane %v429_v61, 0  ;;  %v432_v63 = vperm.slane %v429_v61, 1  ;;  %vm477_vm7 = vcmp.lt.s32.totalorder %v1478_v27, 111  ;;  %vm326_vm8 = vcmp.lt.s32.totalorder %v1478_v27, 15 }
  0x40   : > { %v452_v7 = vld [vmem:[#allocation9 + $0x7] ss:$8 sm:$0x3]  ;;  %s261_s6 = scalar_lea.vmem [#allocation11], %s989_s7  ;;  %s879_s8 = sshll.u32 %s875_s5, 4  ;;  %s880_s8 = int_to_ptr.hbm [resolvable:$true] %s879_s8 }
  0x41   : > { %v454_v8 = vperm.slane %v452_v7, 0  ;;  %s877_s19 = sshll.u32 %s261_s6, 4  ;;  %s864_s10 = scalar_lea.sflag [#allocation5], %s1443_s29  ;;  %s878_s19 = int_to_ptr.vmem [resolvable:$true] %s877_s19 }
  0x42   : > { %s1240_s7 = scalar_lea.hbm %s1628_s4, 16 }
  0x46   : > { %v289_v4 = vld.sshfl [vmem:[#allocation1] sm:$0xff pattern:$0x75316420]  ;;  %v290_v5 = vld.sshfl [vmem:[#allocation1 + $0x8] sm:$0xff pattern:$0x75316420] }
  0x47   : > { %317 = vst [vmem:[#allocation1] ss:$2 sm:$0xff] %v262_v0  ;;  %293 = vrot.lane.b32.xlu1 %v289_v4, %s1301_s21  ;;  %295 = vrot.lane.b32.xlu2 %v290_v5, %s1301_s21 }
  0x4e   : > { %v318_v9 = vld.sshfl [vmem:[#allocation1] sm:$0xff pattern:$0x75316420]  ;;  %v319_v10 = vld.sshfl [vmem:[#allocation1 + $0x8] sm:$0xff pattern:$0x75316420] }
  0x4f   : > { %322 = vrot.lane.b32.xlu0 %v318_v9, %s1302_s26  ;;  %340 = vst [vmem:[#allocation1] ss:$2 sm:$0xff] %v262_v0  ;;  %v455_v9 = vperm.slane %v452_v7, 1 }
  0x56   : > { %v341_v13 = vld.sshfl [vmem:[#allocation1] sm:$0xff pattern:$0x75316420]  ;;  %v342_v14 = vld.sshfl [vmem:[#allocation1 + $0x8] sm:$0xff pattern:$0x75316420] }
  0x57   : > { %347 = vrot.lane.b32.xlu0 %v342_v14, %s1303_s9  ;;  %380 = vst [vmem:[#allocation1] ss:$2 sm:$0xff] %v378_v12  ;;  %345 = vrot.lane.b32.xlu2 %v341_v13, %s1303_s9 }
  0x5e   : > { %v381_v15 = vld.sshfl [vmem:[#allocation1] sm:$0xff pattern:$0x75316420]  ;;  %v382_v16 = vld.sshfl [vmem:[#allocation1 + $0x8] sm:$0xff pattern:$0x75316420] }
  0x5f   : > { %387 = vst [vmem:[#allocation1] ss:$2 sm:$0xff] %v262_v0 }
  0x60   : > { %385 = vst [vmem:[#allocation2 + $0x48] sm:$0xf] %v381_v15 }
  0x61   : > { %386 = vst [vmem:[#allocation2 + $0x28] sm:$0xf] %v382_v16  ;;  %v278_v16 = vld [vmem:[#allocation9] ss:$8 sm:$0x3] }
  0x66   : > { %v388_v17 = vld.sshfl [vmem:[#allocation1] sm:$0xff pattern:$0x75316420]  ;;  %v389_v18 = vld.sshfl [vmem:[#allocation1 + $0x8] sm:$0xff pattern:$0x75316420] }
  0x67   : > { %416 = vst [vmem:[#allocation1] ss:$2 sm:$0xff] %v262_v0  ;;  %392 = vrot.lane.b32.xlu2 %v388_v17, %s1304_s11  ;;  %v481_v17 = vld [vmem:[#allocation9 + $0x10] ss:$8 sm:$0x3] }
  0x6e   : > { %v417_v19 = vld.sshfl [vmem:[#allocation1] sm:$0xff pattern:$0x75316420]  ;;  %v418_v20 = vld.sshfl [vmem:[#allocation1 + $0x8] sm:$0xff pattern:$0x75316420] }
  0x6f   : > { %421 = vrot.lane.b32.xlu0 %v417_v19, %s1305_s12  ;;  %423 = vrot.lane.b32.xlu1 %v418_v20, %s1305_s12  ;;  %439 = vst [vmem:[#allocation1] ss:$2 sm:$0xff] %v262_v0 }
  0x70   : > { %394 = vrot.lane.b32.xlu2 %v389_v18, %s1304_s11 }
  0x76   : > { %v440_v21 = vld.sshfl [vmem:[#allocation1] sm:$0xff pattern:$0x75316420]  ;;  %v441_v22 = vld.sshfl [vmem:[#allocation1 + $0x8] sm:$0xff pattern:$0x75316420] }
  0x77   : > { %444 = vrot.lane.b32.xlu0 %v440_v21, %s1306_s13  ;;  %468 = vst [vmem:[#allocation1] ss:$2 sm:$0xff] %v262_v0  ;;  %v280_v21 = vperm.slane %v278_v16, 0 }
  0x78   : > { %269 = vrot.lane.b32.xlu2 %v265_v1, %s1307_s14 }
  0x7e   : > { %v469_v23 = vld.sshfl [vmem:[#allocation1] sm:$0xff pattern:$0x75316420]  ;;  %v470_v24 = vld.sshfl [vmem:[#allocation1 + $0x8] sm:$0xff pattern:$0x75316420] }
  0x7f   : > { %446 = vrot.lane.b32.xlu0 %v441_v22, %s1306_s13  ;;  %473 = vrot.lane.b32.xlu1 %v469_v23, %s1308_s20  ;;  %850 = vst [vmem:[#allocation1] ss:$2 sm:$0xff] %v262_v0  ;;  %v281_v22 = vperm.slane %v278_v16, 1  ;;  %v483_v23 = vperm.slane %v481_v17, 0 }
  0x87   : > { %271 = vrot.lane.b32.xlu0 %v266_v2, %s1307_s14  ;;  %475 = vrot.lane.b32.xlu1 %v470_v24, %s1308_s20  ;;  %v484_v24 = vperm.slane %v481_v17, 1  ;;  %v666_v17 = vld [vmem:[#allocation9 + $0x4] ss:$8 sm:$0x3] }
  0x8f   : > { %324 = vrot.lane.b32.xlu1 %v319_v10, %s1302_s26 }
  0xa1   : > { %v296_v25 = vpop.permute.xlu2 %295 }
  0xb1   : > { %v346_v31 = vpop.permute.xlu2 %345 }
  0xb9   : > { %v294_v32 = vpop.permute.xlu1 %293 }
  0xba   : > { %v298_v33 = vsel %vm297_vm1, %v294_v32, %v296_v25  ;;  %v299_v34 = vsel %vm297_vm1, %v296_v25, %v294_v32 }
  0xbb   : > { %v307_v35 = vmul.f32 %v303_v29, %v299_v34  ;;  %v308_v36 = vmul.f32 %v304_v30, %v298_v33 }
  0xbd   : > { %v311_v37 = vrot.slane %v307_v35, 4  ;;  %v312_v38 = vrot.slane %v308_v36, 4  ;;  %v330_v36 = vld [vmem:[#allocation9 + $0x2] ss:$8 sm:$0x3] }
  0xbf   : > { %315 = vst [vmem:[#allocation2 + $0x30] sm:$0xf0] %v311_v37  ;;  %v332_v37 = vperm.slane %v330_v36, 0 }
  0xc0   : > { %316 = vst [vmem:[#allocation2] sm:$0xf0] %v312_v38  ;;  %v333_v38 = vperm.slane %v330_v36, 1 }
  0xc1   : > { %v1485_v39 = vpop.permute.xlu0 %322  ;;  %v393_v40 = vpop.permute.xlu2 %392 }
  0xc9   : > { %v348_v44 = vpop.permute.xlu0 %347 }
  0xca   : > { %v350_v46 = vsel %vm349_vm2, %v346_v31, %v348_v44  ;;  %v351_v47 = vsel %vm349_vm2, %v348_v44, %v346_v31  ;;  %v395_v50 = vpop.permute.xlu2 %394 }
  0xcb   : > { %v359_v51 = vmul.f32 %v355_v42, %v351_v47  ;;  %v360_v52 = vmul.f32 %v356_v43, %v350_v46  ;;  %v397_v53 = vsel %vm396_vm3, %v393_v40, %v395_v50  ;;  %v398_v54 = vsel %vm396_vm3, %v395_v50, %v393_v40 }
  0xcc   : > { %v406_v55 = vmul.f32 %v402_v48, %v397_v53  ;;  %v407_v56 = vmul.f32 %v403_v49, %v398_v54 }
  0xcd   : > { %v363_v57 = vrot.slane %v359_v51, 4  ;;  %v364_v58 = vrot.slane %v360_v52, 4  ;;  %v491_v52 = vld [vmem:[#allocation6] sm:$0xf] }
  0xce   : > { %v410_v59 = vrot.slane %v406_v55, 4  ;;  %v411_v60 = vrot.slane %v407_v56, 4 }
  0xcf   : > { %367 = vst [vmem:[#allocation2 + $0x18] sm:$0xf0] %v363_v57 }
  0xd0   : > { %368 = vst [vmem:[#allocation2 + $0x10] sm:$0xf0] %v364_v58 }
  0xd1   : > { %414 = vst [vmem:[#allocation2 + $0x48] sm:$0xf0] %v410_v59 }
  0xd2   : > { %415 = vst [vmem:[#allocation2 + $0x28] sm:$0xf0] %v411_v60  ;;  %v270_v20 = vpop.permute.xlu2 %269 }
  0xd8   : > { %v496_v49 = vld [vmem:[#allocation2 + $0x48] sm:$0xff] }
  0xd9   : > { %v497_v50 = vld [vmem:[#allocation2 + $0x28] sm:$0xff] }
  0xe1   : > { %v422_v0 = vpop.permute.xlu0 %421  ;;  %v424_v1 = vpop.permute.xlu1 %423 }
  0xe2   : > { %v426_v2 = vsel %vm425_vm4, %v422_v0, %v424_v1  ;;  %v427_v3 = vsel %vm425_vm4, %v424_v1, %v422_v0 }
  0xe3   : > { %v435_v4 = vmul.f32 %v431_v62, %v426_v2  ;;  %v436_v5 = vmul.f32 %v432_v63, %v427_v3 }
  0xe5   : > { %437 = vst [vmem:[#allocation2 + $0x8] sm:$0xf] %v435_v4 }
  0xe6   : > { %438 = vst [vmem:[#allocation2 + $0x20] sm:$0xf] %v436_v5 }
  0xe9   : > { %v445_v6 = vpop.permute.xlu0 %444 }
  0xf1   : > { %v447_v10 = vpop.permute.xlu0 %446  ;;  %v474_v11 = vpop.permute.xlu1 %473 }
  0xf2   : > { %v449_v12 = vsel %vm448_vm5, %v445_v6, %v447_v10  ;;  %v450_v13 = vsel %vm448_vm5, %v447_v10, %v445_v6 }
  0xf3   : > { %v458_v14 = vmul.f32 %v454_v8, %v449_v12  ;;  %v459_v15 = vmul.f32 %v455_v9, %v450_v13 }
  0xf5   : > { %v462_v18 = vrot.slane %v458_v14, 4  ;;  %v463_v19 = vrot.slane %v459_v15, 4 }
  0xf7   : > { %466 = vst [vmem:[#allocation2 + $0x8] sm:$0xf0] %v462_v18 }
  0xf8   : > { %467 = vst [vmem:[#allocation2 + $0x20] sm:$0xf0] %v463_v19 }
  0xf9   : > { %v272_v25 = vpop.permute.xlu0 %271  ;;  %v476_v26 = vpop.permute.xlu1 %475 }
  0xfa   : > { %v276_v28 = vsel %vm275_vm6, %v270_v20, %v272_v25  ;;  %v277_v29 = vsel %vm275_vm6, %v272_v25, %v270_v20  ;;  %v478_v30 = vsel %vm477_vm7, %v474_v11, %v476_v26  ;;  %v479_v31 = vsel %vm477_vm7, %v476_v26, %v474_v11 }
  0xfb   : > { %v284_v32 = vmul.f32 %v280_v21, %v277_v29  ;;  %v285_v33 = vmul.f32 %v281_v22, %v276_v28  ;;  %v487_v34 = vmul.f32 %v483_v23, %v478_v30  ;;  %v488_v35 = vmul.f32 %v484_v24, %v479_v31 }
  0xfc   : > { %v668_v21 = vperm.slane %v666_v17, 0  ;;  %v669_v22 = vperm.slane %v666_v17, 1 }
  0xfd   : > { %286 = vst [vmem:[#allocation2 + $0x30] sm:$0xf] %v284_v32 }
  0xfe   : > { %287 = vst [vmem:[#allocation2] sm:$0xf] %v285_v33  ;;  %v498_v47 = vld [vmem:[#allocation2 + $0x8] sm:$0xff] }
  0xff   : > { %489 = vst [vmem:[#allocation2 + $0x40] sm:$0xf] %v487_v34  ;;  %v499_v48 = vld [vmem:[#allocation2 + $0x20] sm:$0xff]  ;;  %v612_v33 = vld [vmem:[#allocation9 + $0x1] ss:$8 sm:$0x3] }
 0x100   : > { %490 = vst [vmem:[#allocation2 + $0x38] sm:$0xf] %v488_v35  ;;  %v720_v34 = vld [vmem:[#allocation9 + $0x7] ss:$8 sm:$0x3]  ;;  %v614_v35 = vperm.slane %v612_v33, 0 }
 0x101   : > { %v325_v40 = vpop.permute.xlu1 %324  ;;  %v615_v36 = vperm.slane %v612_v33, 1  ;;  %v634_v33 = vld [vmem:[#allocation9 + $0x2] ss:$8 sm:$0x3] }
 0x102   : > { %v327_v41 = vsel %vm326_vm8, %v1485_v39, %v325_v40  ;;  %v328_v42 = vsel %vm326_vm8, %v325_v40, %v1485_v39 }
 0x103   : > { %v336_v43 = vmul.f32 %v332_v37, %v328_v42  ;;  %v337_v44 = vmul.f32 %v333_v38, %v327_v41  ;;  %v722_v37 = vperm.slane %v720_v34, 0  ;;  %v723_v38 = vperm.slane %v720_v34, 1 }
 0x104   : > { %v492_v53 = vld [vmem:[#allocation2 + $0x30] sm:$0xff] }
 0x105   : > { %338 = vst [vmem:[#allocation2 + $0x18] sm:$0xf] %v336_v43  ;;  %v493_v54 = vld [vmem:[#allocation2] sm:$0xff] }
 0x106   : > { %339 = vst [vmem:[#allocation2 + $0x10] sm:$0xf] %v337_v44  ;;  %v500_v45 = vld [vmem:[#allocation2 + $0x40] sm:$0xf] }
 0x107   : > { %994 = vmatpush.msk.msra.mxu0 %vm375_vm0, %v500_v45  ;;  %v501_v46 = vld [vmem:[#allocation2 + $0x38] sm:$0xf] }
 0x108   : > { %996 = vmatpush.msk.msra.mxu1 %vm375_vm0, %v501_v46 }
 0x109   : > { %524 = vmatpush.msra.mxu0 %v498_v47 }
 0x10a   : > { %544 = vmatpush.msra.mxu1 %v499_v48 }
 0x10b   : > { %525 = vmatpush.msra.mxu0 %v496_v49 }
 0x10c   : > { %545 = vmatpush.msra.mxu1 %v497_v50  ;;  %v494_v51 = vld [vmem:[#allocation2 + $0x18] sm:$0xff] }
 0x10d   : > { %526 = vmatpush.msra.mxu0 %v494_v51  ;;  %v495_v39 = vld [vmem:[#allocation2 + $0x10] sm:$0xff] }
 0x10e   : > { %546 = vmatpush.msra.mxu1 %v495_v39 }
 0x10f   : > { %527 = vmatpush.msra.mxu0 %v492_v53 }
 0x110   : > { %547 = vmatpush.msra.mxu1 %v493_v54  ;;  %995 = vmatmul.msk.f32.vlgmr.msra.gmra.mxu0 %vm502_vm9, %v491_v52 }
 0x111   : > { %997 = vmatmul.msk.f32.vlgmr.msra.gmra.mxu1 %vm502_vm9, %v491_v52 }
 0x18d   : > { %v529_v55 = vpop.f32.mrf.mxu0 }
 0x18e   : > { %v552_v56 = vsel %vm375_vm0, %v529_v55, 0.0  ;;  %v557_v57 = vmul.f32 %v529_v55, %v529_v55  ;;  %v549_v58 = vpop.f32.mrf.mxu1 }
 0x18f   : > { %v553_v59 = vsel %vm375_vm0, %v549_v58, 0.0  ;;  %v558_v60 = vmul.f32 %v549_v58, %v549_v58 }
 0x190   : > { %v554_v61 = vadd.f32 %v553_v59, %v552_v56  ;;  %v559_v62 = vsel %vm375_vm0, %v557_v57, 0.0 }
 0x191   : > { %v560_v63 = vsel %vm375_vm0, %v558_v60, 0.0 }
 0x192   : > { %555 = vadd.xlane.f32.xlu1 %v554_v61  ;;  %v561_v0 = vadd.f32 %v560_v63, %v559_v62  ;;  %v682_v63 = vld [vmem:[#allocation9 + $0x5] ss:$8 sm:$0x3] }
 0x194   : > { %562 = vadd.xlane.f32.xlu2 %v561_v0  ;;  %v684_v0 = vperm.slane %v682_v63, 0 }
 0x205   : > { %v556_v1 = vpop.xlane.xlu1 %555 }
 0x206   : > { %v564_v2 = vmul.f32 0.00390625, %v556_v1  ;;  %v685_v1 = vperm.slane %v682_v63, 1 }
 0x207   : > { %v563_v3 = vpop.xlane.xlu2 %562 }
 0x208   : > { %v565_v4 = vmul.f32 0.00390625, %v563_v3  ;;  %v566_v5 = vmul.f32 %v564_v2, %v564_v2  ;;  %v569_v15 = vsub.f32 %v529_v55, %v564_v2  ;;  %v570_v16 = vsub.f32 %v549_v58, %v564_v2  ;;  %v742_v55 = vld [vmem:[#allocation9 + $0x10] ss:$8 sm:$0x3] }
 0x209   : > { %v744_v56 = vperm.slane %v742_v55, 0  ;;  %v745_v57 = vperm.slane %v742_v55, 1  ;;  %v752_v55 = vld [vmem:[#allocation8] sm:$0xf] }
 0x20a   : > { %v567_v6 = vsub.f32 %v565_v4, %v566_v5 }
 0x20c   : > { %v568_v7 = vmax.f32 %v567_v6, 0.0 }
 0x20e   : > { %v571_v8 = vadd.f32 1e-05, %v568_v7 }
 0x210   : > { %1096 = vrsqrt.f32 %v571_v8  ;;  %vm578_vm11 = vweird.f32 %v571_v8 }
 0x216   : > { %v1097_v9 = vpop.eup %1096 }
 0x217   : > { %v573_v10 = vmul.f32 %v1097_v9, %v571_v8  ;;  %vm579_vm10 = vweird.f32 %v1097_v9  ;;  %v704_v8 = vld [vmem:[#allocation9 + $0x6] ss:$8 sm:$0x3] }
 0x218   : > { %vm580_vm12 = vmor %vm578_vm11, %vm579_vm10 }
 0x219   : > { %v574_v11 = vmul.f32 %v1097_v9, %v573_v10 }
 0x21b   : > { %v575_v12 = vmul.f32 0.5, %v574_v11 }
 0x21d   : > { %v576_v13 = vsub.f32 1.5, %v575_v12  ;;  %v706_v12 = vperm.slane %v704_v8, 0 }
 0x21f   : > { %v577_v14 = vmul.f32 %v1097_v9, %v576_v13  ;;  %v707_v13 = vperm.slane %v704_v8, 1 }
 0x221   : > { %v581_v18 = vsel %vm580_vm12, %v1097_v9, %v577_v14 }
 0x222   : > { %v582_v19 = vmul.f32 %v581_v18, %v569_v15  ;;  %v583_v20 = vmul.f32 %v581_v18, %v570_v16 }
 0x224   : > { %vm584_vm13 = vcmp.gt.f32.partialorder %v582_v19, 0.0  ;;  %vm585_vm14 = vcmp.gt.f32.partialorder %v583_v20, 0.0  ;;  %v586_v23 = vmul.f32 0.2, %v582_v19  ;;  %v587_v24 = vmul.f32 0.2, %v583_v20 }
 0x226   : > { %v588_v25 = vsel %vm584_vm13, %v582_v19, %v586_v23  ;;  %v589_v26 = vsel %vm585_vm14, %v583_v20, %v587_v24 }
 0x227   : > { %v672_v28 = vmul.f32 %v668_v21, %v588_v25  ;;  %v673_v29 = vmul.f32 %v669_v22, %v589_v26  ;;  %678 = vrot.lane.b32.xlu2 %v589_v26, %s1304_s11  ;;  %698 = vrot.lane.b32.xlu1 %v588_v25, %s1305_s12  ;;  %v650_v21 = vld [vmem:[#allocation9 + $0x3] ss:$8 sm:$0x3] }
 0x228   : > { %714 = vrot.lane.b32.xlu0 %v588_v25, %s1306_s13 }
 0x229   : > { %674 = vst [vmem:[#allocation2 + $0x48] sm:$0xf] %v672_v28 }
 0x22a   : > { %675 = vst [vmem:[#allocation2 + $0x28] sm:$0xf] %v673_v29 }
 0x22f   : > { %606 = vrot.lane.b32.xlu2 %v588_v25, %s1301_s21  ;;  %608 = vrot.lane.b32.xlu1 %v589_v26, %s1301_s21  ;;  %s1234_s21 = sshra.s32 %s880_s8, 4  ;;  %s1235_s21 = int_to_ptr.hbm [resolvable:$true] %s1234_s21 }
 0x230   : > { %716 = vrot.lane.b32.xlu0 %v589_v26, %s1306_s13  ;;  %p1241_p9 = scmp.lt.s32.totalorder %s1235_s21, %s1628_s4 }
 0x237   : > { %630 = vrot.lane.b32.xlu2 %v589_v26, %s1302_s26  ;;  %590 = vrot.lane.b32.xlu1 %v588_v25, %s1307_s14 }
 0x238   : > { %736 = vrot.lane.b32.xlu0 %v588_v25, %s1308_s20 }
 0x240   : > { %738 = vrot.lane.b32.xlu0 %v589_v26, %s1308_s20 }
 0x248   : > { %676 = vrot.lane.b32.xlu0 %v588_v25, %s1304_s11 }
 0x250   : > { %700 = vrot.lane.b32.xlu0 %v589_v26, %s1305_s12 }
 0x258   : > { %644 = vrot.lane.b32.xlu0 %v588_v25, %s1303_s9 }
 0x260   : > { %646 = vrot.lane.b32.xlu0 %v589_v26, %s1303_s9 }
 0x268   : > { %628 = vrot.lane.b32.xlu0 %v588_v25, %s1302_s26  ;;  %v652_v25 = vperm.slane %v650_v21, 0  ;;  %s1236_s26 = scalar_lea.hbm %s1235_s21, 8 }
 0x269   : > { %p1237_p1 = scmp.ne.s32.totalorder %s1235_s21, %s1236_s26  ;;  %p1242_p10 = scmp.lt.s32.totalorder %s1240_s7, %s1236_s26 }
 0x26b   : > { %p1238_p4 = pnand %p1237_p1, %p1416_p3  ;;  %p1243_p2 = por %p1242_p10, %p1241_p9 }
 0x26d   : > { %p1239_p8 = pneg %p1238_p4 }
 0x26f   : > { %p1244_p11 = pnand %p1243_p2, %p1239_p8 }
 0x270   : > { %592 = vrot.lane.b32.xlu0 %v589_v26, %s1307_s14  ;;  %v653_v26 = vperm.slane %v650_v21, 1 }
 0x281   : > { %v679_v30 = vpop.permute.xlu2 %678 }
 0x289   : > { %v607_v40 = vpop.permute.xlu2 %606 }
 0x299   : > { %v699_v31 = vpop.permute.xlu1 %698 }
 0x29a   : > { %v715_v32 = vpop.permute.xlu0 %714 }
 0x2a1   : > { %v609_v41 = vpop.permute.xlu1 %608 }
 0x2a2   : > { %v610_v42 = vsel %vm297_vm1, %v607_v40, %v609_v41  ;;  %v611_v43 = vsel %vm297_vm1, %v609_v41, %v607_v40  ;;  %v717_v44 = vpop.permute.xlu0 %716 }
 0x2a3   : > { %v618_v45 = vmul.f32 %v614_v35, %v611_v43  ;;  %v619_v46 = vmul.f32 %v615_v36, %v610_v42  ;;  %v718_v47 = vsel %vm448_vm5, %v715_v32, %v717_v44  ;;  %v719_v48 = vsel %vm448_vm5, %v717_v44, %v715_v32 }
 0x2a4   : > { %v726_v49 = vmul.f32 %v722_v37, %v718_v47  ;;  %v727_v50 = vmul.f32 %v723_v38, %v719_v48  ;;  %v636_v36 = vperm.slane %v634_v33, 0  ;;  %v637_v37 = vperm.slane %v634_v33, 1  ;;  %v631_v38 = vpop.permute.xlu2 %630 }
 0x2a5   : > { %v622_v51 = vrot.slane %v618_v45, 4  ;;  %v623_v39 = vrot.slane %v619_v46, 4  ;;  %v596_v45 = vld [vmem:[#allocation9] ss:$8 sm:$0x3] }
 0x2a6   : > { %v730_v52 = vrot.slane %v726_v49, 4  ;;  %v731_v53 = vrot.slane %v727_v50, 4  ;;  %v598_v46 = vperm.slane %v596_v45, 0  ;;  %v599_v47 = vperm.slane %v596_v45, 1 }
 0x2a7   : > { %626 = vst [vmem:[#allocation2 + $0x30] sm:$0xf0] %v622_v51 }
 0x2a8   : > { %627 = vst [vmem:[#allocation2] sm:$0xf0] %v623_v39 }
 0x2a9   : > { %734 = vst [vmem:[#allocation2 + $0x8] sm:$0xf0] %v730_v52  ;;  %v591_v48 = vpop.permute.xlu1 %590 }
 0x2aa   : > { %735 = vst [vmem:[#allocation2 + $0x20] sm:$0xf0] %v731_v53  ;;  %v737_v54 = vpop.permute.xlu0 %736 }
 0x2b2   : > { %v739_v58 = vpop.permute.xlu0 %738 }
 0x2b3   : > { %v740_v59 = vsel %vm477_vm7, %v737_v54, %v739_v58  ;;  %v741_v60 = vsel %vm477_vm7, %v739_v58, %v737_v54 }
 0x2b4   : > { %v748_v61 = vmul.f32 %v744_v56, %v740_v59  ;;  %v749_v62 = vmul.f32 %v745_v57, %v741_v60 }
 0x2b6   : > { %750 = vst [vmem:[#allocation2 + $0x40] sm:$0xf] %v748_v61 }
 0x2b7   : > { %751 = vst [vmem:[#allocation2 + $0x38] sm:$0xf] %v749_v62 }
 0x2ba   : > { %v677_v2 = vpop.permute.xlu0 %676 }
 0x2bb   : > { %v680_v3 = vsel %vm396_vm3, %v677_v2, %v679_v30  ;;  %v681_v4 = vsel %vm396_vm3, %v679_v30, %v677_v2 }
 0x2bc   : > { %v688_v5 = vmul.f32 %v684_v0, %v680_v3  ;;  %v689_v6 = vmul.f32 %v685_v1, %v681_v4 }
 0x2bd   : > { %v761_v7 = vld [vmem:[#allocation2 + $0x40] sm:$0xf] }
 0x2be   : > { %v692_v9 = vrot.slane %v688_v5, 4  ;;  %v693_v10 = vrot.slane %v689_v6, 4  ;;  %998 = vmatpush.msk.msra.mxu2 %vm375_vm0, %v761_v7  ;;  %v762_v11 = vld [vmem:[#allocation2 + $0x38] sm:$0xf] }
 0x2bf   : > { %1000 = vmatpush.msk.msra.mxu3 %vm375_vm0, %v762_v11 }
 0x2c0   : > { %696 = vst [vmem:[#allocation2 + $0x48] sm:$0xf0] %v692_v9 }
 0x2c1   : > { %697 = vst [vmem:[#allocation2 + $0x28] sm:$0xf0] %v693_v10 }
 0x2c2   : > { %v701_v14 = vpop.permute.xlu0 %700 }
 0x2c3   : > { %v702_v15 = vsel %vm425_vm4, %v699_v31, %v701_v14  ;;  %v703_v16 = vsel %vm425_vm4, %v701_v14, %v699_v31 }
 0x2c4   : > { %v710_v17 = vmul.f32 %v706_v12, %v702_v15  ;;  %v711_v18 = vmul.f32 %v707_v13, %v703_v16 }
 0x2c6   : > { %712 = vst [vmem:[#allocation2 + $0x8] sm:$0xf] %v710_v17 }
 0x2c7   : > { %713 = vst [vmem:[#allocation2 + $0x20] sm:$0xf] %v711_v18  ;;  %v757_v23 = vld [vmem:[#allocation2 + $0x48] sm:$0xff] }
 0x2c8   : > { %v758_v24 = vld [vmem:[#allocation2 + $0x28] sm:$0xff] }
 0x2ca   : > { %v645_v19 = vpop.permute.xlu0 %644 }
 0x2cd   : > { %v759_v20 = vld [vmem:[#allocation2 + $0x8] sm:$0xff] }
 0x2ce   : > { %784 = vmatpush.msra.mxu2 %v759_v20  ;;  %v760_v22 = vld [vmem:[#allocation2 + $0x20] sm:$0xff] }
 0x2cf   : > { %804 = vmatpush.msra.mxu3 %v760_v22  ;;  %v852_v22 = vld.sshfl [vmem:[#allocation1 + $0x8] sm:$0xff pattern:$0x75316420] }
 0x2d0   : > { %785 = vmatpush.msra.mxu2 %v757_v23 }
 0x2d1   : > { %805 = vmatpush.msra.mxu3 %v758_v24 }
 0x2d2   : > { %v647_v28 = vpop.permute.xlu0 %646 }
 0x2d3   : > { %v648_v29 = vsel %vm349_vm2, %v645_v19, %v647_v28  ;;  %v649_v30 = vsel %vm349_vm2, %v647_v28, %v645_v19  ;;  %v851_v28 = vld.sshfl [vmem:[#allocation1] sm:$0xff pattern:$0x75316420] }
 0x2d4   : > { %v656_v31 = vmul.f32 %v652_v25, %v649_v30  ;;  %v657_v32 = vmul.f32 %v653_v26, %v648_v29 }
 0x2d6   : > { %v660_v34 = vrot.slane %v656_v31, 4  ;;  %v661_v35 = vrot.slane %v657_v32, 4 }
 0x2d8   : > { %664 = vst [vmem:[#allocation2 + $0x18] sm:$0xf0] %v660_v34 }
 0x2d9   : > { %665 = vst [vmem:[#allocation2 + $0x10] sm:$0xf0] %v661_v35 }
 0x2da   : > { %v629_v40 = vpop.permute.xlu0 %628 }
 0x2db   : > { %v632_v41 = vsel %vm326_vm8, %v629_v40, %v631_v38  ;;  %v633_v42 = vsel %vm326_vm8, %v631_v38, %v629_v40 }
 0x2dc   : > { %v640_v43 = vmul.f32 %v636_v36, %v633_v42  ;;  %v641_v44 = vmul.f32 %v637_v37, %v632_v41 }
 0x2de   : > { %642 = vst [vmem:[#allocation2 + $0x18] sm:$0xf] %v640_v43 }
 0x2df   : > { %643 = vst [vmem:[#allocation2 + $0x10] sm:$0xf] %v641_v44 }
 0x2e2   : > { %v593_v49 = vpop.permute.xlu0 %592 }
 0x2e3   : > { %v594_v50 = vsel %vm275_vm6, %v591_v48, %v593_v49  ;;  %v595_v51 = vsel %vm275_vm6, %v593_v49, %v591_v48 }
 0x2e4   : > { %v602_v39 = vmul.f32 %v598_v46, %v595_v51  ;;  %v603_v52 = vmul.f32 %v599_v47, %v594_v50 }
 0x2e5   : > { %v755_v53 = vld [vmem:[#allocation2 + $0x18] sm:$0xff] }
 0x2e6   : > { %604 = vst [vmem:[#allocation2 + $0x30] sm:$0xf] %v602_v39  ;;  %786 = vmatpush.msra.mxu2 %v755_v53  ;;  %v756_v54 = vld [vmem:[#allocation2 + $0x10] sm:$0xff] }
 0x2e7   : > { %605 = vst [vmem:[#allocation2] sm:$0xf] %v603_v52  ;;  %806 = vmatpush.msra.mxu3 %v756_v54 }
 0x2ed   : > { %v753_v56 = vld [vmem:[#allocation2 + $0x30] sm:$0xff] }
 0x2ee   : > { %787 = vmatpush.msra.mxu2 %v753_v56  ;;  %v754_v57 = vld [vmem:[#allocation2] sm:$0xff] }
 0x2ef   : > { %807 = vmatpush.msra.mxu3 %v754_v57  ;;  %999 = vmatmul.msk.f32.vlgmr.msra.gmra.mxu2 %vm502_vm9, %v752_v55 }
 0x2f0   : > { %1001 = vmatmul.msk.f32.vlgmr.msra.gmra.mxu3 %vm502_vm9, %v752_v55 }
 0x372   : > { %v789_v58 = vpop.f32.mrf.mxu2 }
 0x373   : > { %v812_v27 = vsel %vm375_vm0, %v789_v58, 0.0  ;;  %v817_v59 = vmul.f32 %v789_v58, %v789_v58  ;;  %v809_v60 = vpop.f32.mrf.mxu3 }
 0x374   : > { %v813_v61 = vsel %vm375_vm0, %v809_v60, 0.0  ;;  %v818_v62 = vmul.f32 %v809_v60, %v809_v60 }
 0x375   : > { %v814_v63 = vadd.f32 %v813_v61, %v812_v27  ;;  %v819_v0 = vsel %vm375_vm0, %v817_v59, 0.0 }
 0x376   : > { %v820_v1 = vsel %vm375_vm0, %v818_v62, 0.0 }
 0x377   : > { %815 = vadd.xlane.f32.xlu2 %v814_v63  ;;  %v821_v2 = vadd.f32 %v820_v1, %v819_v0 }
 0x379   : > { %822 = vadd.xlane.f32.xlu1 %v821_v2 }
 0x3ea   : > { %v816_v3 = vpop.xlane.xlu2 %815 }
 0x3eb   : > { %v824_v4 = vmul.f32 0.00390625, %v816_v3 }
 0x3ec   : > { %v823_v5 = vpop.xlane.xlu1 %822 }
 0x3ed   : > { %v825_v6 = vmul.f32 0.00390625, %v823_v5  ;;  %v826_v7 = vmul.f32 %v824_v4, %v824_v4  ;;  %v829_v17 = vsub.f32 %v789_v58, %v824_v4  ;;  %v830_v18 = vsub.f32 %v809_v60, %v824_v4 }
 0x3ef   : > { %v827_v8 = vsub.f32 %v825_v6, %v826_v7 }
 0x3f1   : > { %v828_v9 = vmax.f32 %v827_v8, 0.0 }
 0x3f3   : > { %v831_v10 = vadd.f32 1e-05, %v828_v9 }
 0x3f5   : > { %1098 = vrsqrt.f32 %v831_v10  ;;  %vm838_vm1 = vweird.f32 %v831_v10 }
 0x3fb   : > { %v1099_v11 = vpop.eup %1098 }
 0x3fc   : > { %v833_v12 = vmul.f32 %v1099_v11, %v831_v10  ;;  %vm839_vm15 = vweird.f32 %v1099_v11 }
 0x3fd   : > { %vm840_vm2 = vmor %vm838_vm1, %vm839_vm15 }
 0x3fe   : > { %v834_v13 = vmul.f32 %v1099_v11, %v833_v12 }
 0x400   : > { %v835_v14 = vmul.f32 0.5, %v834_v13 }
 0x402   : > { %v836_v15 = vsub.f32 1.5, %v835_v14 }
 0x404   : > { %v837_v16 = vmul.f32 %v1099_v11, %v836_v15 }
 0x406   : > { %v841_v19 = vsel %vm840_vm2, %v1099_v11, %v837_v16 }
 0x407   : > { %v842_v20 = vmul.f32 %v841_v19, %v829_v17  ;;  %v843_v21 = vmul.f32 %v841_v19, %v830_v18 }
 0x409   : > { %vm845_vm3 = vcmp.gt.f32.partialorder %v843_v21, 0.0  ;;  %v846_v23 = vmul.f32 0.2, %v842_v20  ;;  %v847_v24 = vmul.f32 0.2, %v843_v21  ;;  %vm844_vm4 = vcmp.gt.f32.partialorder %v842_v20, 0.0 }
 0x40b   : > { %v848_v25 = vsel %vm844_vm4, %v842_v20, %v846_v23  ;;  %v849_v26 = vsel %vm845_vm3, %v843_v21, %v847_v24 }
 0x40c   : > { %v856_v29 = vadd.f32 %v852_v22, %v849_v26  ;;  %v855_v30 = vadd.f32 %v851_v28, %v848_v25 }
 0x40e   : > { %v859_v31 = vrot.slane %v856_v29, 4 }
 0x410   : > { %v860_v32 = vsel %vm375_vm0, %v855_v30, %v859_v31 }
 0x411   : > { %862 = vst [vmem:[%s261_s6] sm:$0xff] %v860_v32 }
 0x412   : > { %1247 = shalt.err (!%p1244_p11)
}
 0x413   : > { %1023 = dma.vmem_to_hbm [thread:$0]  (%p1416_p3), %s878_s19, 128, %s880_s8, %s864_s10  }
 0x414 PF: > { %s891_s29 = sand.u32 1, %s1282_s15   ;;  %p1635_p12 = scmp.ge.s32.totalorder %s1294_s18, 2 }
 0x415   : > { %s892_s14 = scalar_lea.sflag [#allocation5], %s891_s29 }
 0x416   : > { %p1040_p13 = pnand %p1635_p12, %p1369_p6 }
 0x418   : > { %p1041_p0 = pneg %p1040_p13 }
 0x41a   : > { %1277 = dma.done.wait (%p1041_p0), %s892_s14, 128  }
 0x41b   : > { %1279 = vsyncadd (%p1041_p0), %s892_s14, 4294967168  ;;  %p19_p5 = scmp.ge.s32.totalorder %s1403_s23, 4   ;;  %s1636_s15 = smov %s1286_s16 }
 0x41c   : > { %s1637_s16 = smov %s1290_s17  ;;  %s1638_s17 = smov %s1412_s27 }
 0x41d   : > { %s1639_s18 = smov %s1403_s23  ;;  %21 = sbr.rel (!%p19_p5) target bundleno = 7 (0x7), region = 101 }
 0x422   :  { %898 = vsyncpa [#allocation4], 1 }
 0x423   :  { %900 = vsyncpa [#allocation4 + $0x1], 1 }
 0x424   :  { %901 = vsyncpa [#allocation7], 1 }
 0x425   :  { %902 = vsyncpa [#allocation10], 1 }
 0x426   :  { %903 = vsyncpa [#allocation5], 1 }
 0x427   :  { %905 = vsyncpa [#allocation5 + $0x1], 1 }

</bundles_post_ra>
